<compile_context>
chip_gen: v5e
topology: v5e:2x2
jax: 0.10.0
libtpu: 0.0.40
codegen_flags: <defaults>
</compile_context>

<pallas_src>
import functools

import jax
import jax.numpy as jnp
from jax.experimental import pallas as pl
from jax.experimental.pallas import tpu as pltpu

HIDDEN = 16  # fixed by the PyTorch module (nn.Linear(state_dim, 16), nn.Linear(16, 16), ...)


def _round_up(x, m):
    return ((x + m - 1) // m) * m


def _qnet_kernel(w_ref, b_ref, x_ref, o_ref, *, state_dim, hidden, action_num, pad):
    """One batch tile: x_ref is [state_dim, TB]; o_ref is [action_num, TB]."""
    # Cast the streaming activation tile to bf16 for the MXU.
    x = x_ref[...].astype(jnp.bfloat16)                      # (S, TB)

    # Static slices of the packed, VMEM-resident parameter buffers.
    w1 = w_ref[0][:hidden, :state_dim]                       # (H, S)  bf16
    w2 = w_ref[1][:hidden, :hidden]                          # (H, H)  bf16
    w3 = w_ref[2][:action_num, :hidden]                      # (A, H)  bf16
    b1 = b_ref[0 * pad:0 * pad + hidden, :]                  # (H, 1)  f32
    b2 = b_ref[1 * pad:1 * pad + hidden, :]                  # (H, 1)  f32
    b3 = b_ref[2 * pad:2 * pad + action_num, :]              # (A, 1)  f32

    # bf16 MXU matmuls, f32 accumulation / bias / ReLU (v5e-safe elementwise).
    h1 = jnp.dot(w1, x, preferred_element_type=jnp.float32) + b1
    h1 = jnp.maximum(h1, 0.0)
    h2 = jnp.dot(w2, h1.astype(jnp.bfloat16), preferred_element_type=jnp.float32) + b2
    h2 = jnp.maximum(h2, 0.0)
    out = jnp.dot(w3, h2.astype(jnp.bfloat16), preferred_element_type=jnp.float32) + b3
    o_ref[...] = out.astype(o_ref.dtype)                     # lane-dense store


@functools.partial(jax.jit, static_argnames=("action_num", "hidden", "block_batch"))
def qnet_forward(state, packed_w, packed_b, *, action_num, hidden=HIDDEN,
                 block_batch=512):
    batch, state_dim = state.shape
    pad = packed_w.shape[-1]

    # Batch tile: multiple of 128 so the lane axis is fully dense.
    tb = block_batch if batch >= block_batch else _round_up(batch, 128)
    batch_padded = _round_up(batch, tb)
    n_tiles = batch_padded // tb

    # Layout plumbing: batch on lanes, features on sublanes, zero-pad batch.
    x_t = jnp.pad(state.astype(jnp.float32).T,
                  ((0, 0), (0, batch_padded - batch)))       # (S, Bpad)

    kernel = functools.partial(_qnet_kernel, state_dim=state_dim, hidden=hidden,
                               action_num=action_num, pad=pad)

    out_t = pl.pallas_call(
        kernel,
        out_shape=jax.ShapeDtypeStruct((action_num, batch_padded), jnp.float32),
        grid=(n_tiles,),
        in_specs=[
            # Packed params: constant index_map -> fetched once, VMEM-resident.
            pl.BlockSpec((3, pad, pad), lambda i: (0, 0, 0)),
            pl.BlockSpec((3 * pad, 1), lambda i: (0, 0)),
            # Streaming activation tile: double-buffered / pipelined over batch.
            pl.BlockSpec((state_dim, tb), lambda i: (0, i)),
        ],
        out_specs=pl.BlockSpec((action_num, tb), lambda i: (0, i)),
        compiler_params=pltpu.CompilerParams(
            # Independent batch tiles -> shard the grid across TCs on v7x.
            dimension_semantics=("parallel",),
        ),
    )(packed_w, packed_b, x_t)

    return out_t[:, :batch].T                                # (batch, action_num)


def init_params(key, state_dim, action_num, hidden=HIDDEN):
    """torch.nn.Linear-style init: W is [out, in], b is [out], U(-1/sqrt(fan_in), ...)."""
    ks = jax.random.split(key, 6)

    def linear(kw, kb, fan_in, fan_out):
        bound = 1.0 / jnp.sqrt(jnp.float32(fan_in))
        w = jax.random.uniform(kw, (fan_out, fan_in), jnp.float32, -bound, bound)
        b = jax.random.uniform(kb, (fan_out,), jnp.float32, -bound, bound)
        return w, b

    w1, b1 = linear(ks[0], ks[1], state_dim, hidden)
    w2, b2 = linear(ks[2], ks[3], hidden, hidden)
    w3, b3 = linear(ks[4], ks[5], hidden, action_num)
    return (w1, b1, w2, b2, w3, b3)


def pack_params(params, hidden=HIDDEN):
    """Zero-pad all three layers into one bf16 weight buffer and one f32 bias buffer."""
    w1, b1, w2, b2, w3, b3 = params
    state_dim = w1.shape[1]
    action_num = w3.shape[0]
    pad = max(hidden, state_dim, action_num)

    pw = jnp.zeros((3, pad, pad), jnp.float32)
    pw = pw.at[0, :hidden, :state_dim].set(w1)
    pw = pw.at[1, :hidden, :hidden].set(w2)
    pw = pw.at[2, :action_num, :hidden].set(w3)

    pb = jnp.zeros((3 * pad, 1), jnp.float32)
    pb = pb.at[0 * pad:0 * pad + hidden, 0].set(b1)
    pb = pb.at[1 * pad:1 * pad + hidden, 0].set(b2)
    pb = pb.at[2 * pad:2 * pad + action_num, 0].set(b3)
    return pw.astype(jnp.bfloat16), pb


def qnet_reference_f32(state, params):
    w1, b1, w2, b2, w3, b3 = params
    a = jnp.maximum(state @ w1.T + b1, 0.0)
    a = jnp.maximum(a @ w2.T + b2, 0.0)
    return a @ w3.T + b3


def qnet_reference_bf16(state, params):
    """Mirrors the kernel's bf16-operand / f32-accumulate arithmetic."""
    w1, b1, w2, b2, w3, b3 = params
    bf = jnp.bfloat16

    def lin(x, w, b):
        return jnp.dot(x.astype(bf), w.T.astype(bf),
                       preferred_element_type=jnp.float32) + b

    a = jnp.maximum(lin(state, w1, b1), 0.0)
    a = jnp.maximum(lin(a, w2, b2), 0.0)
    return lin(a, w3, b3)


if __name__ == "__main__":
    key = jax.random.PRNGKey(0)
    k_params, k_state, k_big = jax.random.split(key, 3)

    batch, state_dim, action_num = 2, 4, 2
    params = init_params(k_params, state_dim, action_num)
    packed_w, packed_b = pack_params(params)

    state = jax.random.normal(k_state, (batch, state_dim), jnp.float32)
    out = qnet_forward(state, packed_w, packed_b, action_num=action_num)
    out = jax.block_until_ready(out)

    assert out.shape == (batch, action_num)
    ref_bf = qnet_reference_bf16(state, params)
    ref_f32 = qnet_reference_f32(state, params)
    assert jnp.allclose(out, ref_bf, atol=5e-3, rtol=5e-3)
    assert jnp.allclose(out, ref_f32, atol=5e-2, rtol=5e-2)

    # Exercise the pipelined multi-tile path (batch not a multiple of the tile).
    big_batch = 1000
    big_state = jax.random.normal(k_big, (big_batch, state_dim), jnp.float32)
    big_out = jax.block_until_ready(
        qnet_forward(big_state, packed_w, packed_b, action_num=action_num))
    assert big_out.shape == (big_batch, action_num)
    big_ref = qnet_reference_bf16(big_state, params)
    assert jnp.allclose(big_out, big_ref, atol=5e-3, rtol=5e-3)

    print("KERNEL_OK")
</pallas_src>

<mosaic_0001>
module attributes {stable_mosaic.version = 11 : i64} {
  func.func @_qnet_kernel(%arg0: i32, %arg1: memref<3x16x16xbf16, #tpu.memory_space<vmem>>, %arg2: memref<48x1xf32, #tpu.memory_space<vmem>>, %arg3: memref<4x128xf32, #tpu.memory_space<vmem>>, %arg4: memref<2x128xf32, #tpu.memory_space<vmem>>) attributes {dimension_semantics = [#tpu.dimension_semantics<parallel>], iteration_bounds = array<i64: 1>, scalar_prefetch = 0 : i64, scratch_operands = 0 : i64, tpu.core_type = #tpu.core_type<tc>, window_params = [{pipeline_mode = #tpu.pipeline_mode<synchronous>, transform_indices = @transform_0, window_bounds = array<i64: 3, 16, 16>}, {pipeline_mode = #tpu.pipeline_mode<synchronous>, transform_indices = @transform_1, window_bounds = array<i64: 48, 1>}, {transform_indices = @transform_2, window_bounds = array<i64: 4, 128>}, {transform_indices = @transform_3, window_bounds = array<i64: 2, 128>}]} {
    %c0 = arith.constant 0 : index
    %c0_0 = arith.constant 0 : index
    %0 = vector.load %arg3[%c0, %c0_0] : memref<4x128xf32, #tpu.memory_space<vmem>>, vector<4x128xf32>
    %1 = arith.truncf %0 : vector<4x128xf32> to vector<4x128xbf16>
    %c0_1 = arith.constant 0 : index
    %c0_2 = arith.constant 0 : index
    %c0_3 = arith.constant 0 : index
    %2 = vector.load %arg1[%c0_1, %c0_2, %c0_3] : memref<3x16x16xbf16, #tpu.memory_space<vmem>>, vector<1x16x16xbf16>
    %3 = vector.shape_cast %2 : vector<1x16x16xbf16> to vector<16x16xbf16>
    %4 = vector.extract_strided_slice %3 {offsets = [0, 0], sizes = [16, 4], strides = [1, 1]} : vector<16x16xbf16> to vector<16x4xbf16>
    %c1 = arith.constant 1 : index
    %c0_4 = arith.constant 0 : index
    %c0_5 = arith.constant 0 : index
    %5 = vector.load %arg1[%c1, %c0_4, %c0_5] : memref<3x16x16xbf16, #tpu.memory_space<vmem>>, vector<1x16x16xbf16>
    %6 = vector.shape_cast %5 : vector<1x16x16xbf16> to vector<16x16xbf16>
    %c2 = arith.constant 2 : index
    %c0_6 = arith.constant 0 : index
    %c0_7 = arith.constant 0 : index
    %7 = vector.load %arg1[%c2, %c0_6, %c0_7] : memref<3x16x16xbf16, #tpu.memory_space<vmem>>, vector<1x16x16xbf16>
    %8 = vector.shape_cast %7 : vector<1x16x16xbf16> to vector<16x16xbf16>
    %9 = vector.extract_strided_slice %8 {offsets = [0, 0], sizes = [2, 16], strides = [1, 1]} : vector<16x16xbf16> to vector<2x16xbf16>
    %c0_8 = arith.constant 0 : index
    %c0_9 = arith.constant 0 : index
    %10 = vector.load %arg2[%c0_8, %c0_9] : memref<48x1xf32, #tpu.memory_space<vmem>>, vector<16x1xf32>
    %c16 = arith.constant 16 : index
    %c0_10 = arith.constant 0 : index
    %11 = vector.load %arg2[%c16, %c0_10] : memref<48x1xf32, #tpu.memory_space<vmem>>, vector<16x1xf32>
    %c32 = arith.constant 32 : index
    %c0_11 = arith.constant 0 : index
    %12 = vector.load %arg2[%c32, %c0_11] : memref<48x1xf32, #tpu.memory_space<vmem>>, vector<2x1xf32>
    %cst = arith.constant dense<0.000000e+00> : vector<16x128xf32>
    %13 = tpu.matmul %4, %1, %cst {dimension_numbers = #tpu.dot_dimension_numbers<[1], [0], [0], [1], [0, 0, 1, 1], [], []>} : vector<16x4xbf16>, vector<4x128xbf16>, vector<16x128xf32> -> vector<16x128xf32>
    %14 = vector.broadcast %10 : vector<16x1xf32> to vector<16x128xf32>
    %15 = arith.addf %13, %14 : vector<16x128xf32>
    %cst_12 = arith.constant 0.000000e+00 : f32
    %16 = vector.broadcast %cst_12 : f32 to vector<16x128xf32>
    %17 = arith.maximumf %15, %16 : vector<16x128xf32>
    %18 = arith.truncf %17 : vector<16x128xf32> to vector<16x128xbf16>
    %cst_13 = arith.constant dense<0.000000e+00> : vector<16x128xf32>
    %19 = tpu.matmul %6, %18, %cst_13 {dimension_numbers = #tpu.dot_dimension_numbers<[1], [0], [0], [1], [0, 0, 1, 1], [], []>} : vector<16x16xbf16>, vector<16x128xbf16>, vector<16x128xf32> -> vector<16x128xf32>
    %20 = vector.broadcast %11 : vector<16x1xf32> to vector<16x128xf32>
    %21 = arith.addf %19, %20 : vector<16x128xf32>
    %cst_14 = arith.constant 0.000000e+00 : f32
    %22 = vector.broadcast %cst_14 : f32 to vector<16x128xf32>
    %23 = arith.maximumf %21, %22 : vector<16x128xf32>
    %24 = arith.truncf %23 : vector<16x128xf32> to vector<16x128xbf16>
    %cst_15 = arith.constant dense<0.000000e+00> : vector<2x128xf32>
    %25 = tpu.matmul %9, %24, %cst_15 {dimension_numbers = #tpu.dot_dimension_numbers<[1], [0], [0], [1], [0, 0, 1, 1], [], []>} : vector<2x16xbf16>, vector<16x128xbf16>, vector<2x128xf32> -> vector<2x128xf32>
    %26 = vector.broadcast %12 : vector<2x1xf32> to vector<2x128xf32>
    %27 = arith.addf %25, %26 : vector<2x128xf32>
    %c0_16 = arith.constant 0 : index
    %c0_17 = arith.constant 0 : index
    %28 = vector.load %arg4[%c0_16, %c0_17] : memref<2x128xf32, #tpu.memory_space<vmem>>, vector<2x128xf32>
    tpu.vector_store %arg4[%c0_16, %c0_17], %27 {strides = array<i32>} : memref<2x128xf32, #tpu.memory_space<vmem>>, vector<2x128xf32>,
    return
  }
  func.func @transform_0(%arg0: i32) -> (i32, i32, i32) {
    %c0_i32 = arith.constant 0 : i32
    %c0_i32_0 = arith.constant 0 : i32
    %c0_i32_1 = arith.constant 0 : i32
    %c0_i32_2 = arith.constant 0 : i32
    return %c0_i32, %c0_i32_0, %c0_i32_1 : i32, i32, i32
  }
  func.func @transform_1(%arg0: i32) -> (i32, i32) {
    %c0_i32 = arith.constant 0 : i32
    %c0_i32_0 = arith.constant 0 : i32
    %c0_i32_1 = arith.constant 0 : i32
    return %c0_i32, %c0_i32_0 : i32, i32
  }
  func.func @transform_2(%arg0: i32) -> (i32, i32) {
    %c0_i32 = arith.constant 0 : i32
    %c0_i32_0 = arith.constant 0 : i32
    return %c0_i32, %arg0 : i32, i32
  }
  func.func @transform_3(%arg0: i32) -> (i32, i32) {
    %c0_i32 = arith.constant 0 : i32
    %c0_i32_0 = arith.constant 0 : i32
    return %c0_i32, %arg0 : i32, i32
  }
}

</mosaic_0001>

<bundles_post_ra>
// kernel: qnet_forward.1
= control target key start
LH: loop header
LB: loop body
LE: loop exit
PB: predicated region body
PF: predicated region fallthrough
CT: control target
= control target key end

     0   :  { %vm48_vm0 = vcmask 1041408   ;;  %v151_v1 = vmov 0   ;;  %vm44_vm1 = vcmask 31744   ;;  %vm84_vm2 = vcmask 130048   ;;  %s202_s2 = inlined_call_operand.vmem [shape: f32[4,128], index: 2, kind: input, shape index: {}]   ;;  %s203_s1 = inlined_call_operand.vmem [shape: f32[48,1], index: 1, kind: input, shape index: {}]   ;;  %s204_s0 = inlined_call_operand.vmem [shape: bf16[3,16,16], index: 0, kind: input, shape index: {}]   ;;  %s205_s3 = inlined_call_operand.vmem [shape: f32[2,128], index: 3, kind: output, shape index: {}]  }
   0x1   :  { %v15_v0 = vld [vmem:[%s202_s2] sm:$0xf]  ;;  %148 = vset.pattern.permute.xlu0 %v151_v1  ;;  %149 = vset.pattern.permute.xlu1 %v151_v1  ;;  %v25_v6 = vld [vmem:[%s203_s1 + $0x8] sm:$0xff]  ;;  %v26_v7 = vld [vmem:[%s203_s1 + $0x10] sm:$0xff] }
   0x2   :  { %v24_v2 = vld [vmem:[%s203_s1] sm:$0xff]  ;;  %v16_v3 = vpack.c.bf16 %v15_v0, %v15_v0  ;;  %150 = vset.pattern.permute.xlu2 %v151_v1  ;;  %71 = vperm.xlu1 %149, %v26_v7   ;;  %v27_v8 = vld [vmem:[%s203_s1 + $0x18] sm:$0xff]  ;;  %v146_v18 = vld [vmem:[%s204_s0 + $0x8] sm:$0xff] }
   0x3   :  { %31 = vperm.xlu0 %148, %v24_v2   ;;  %v145_v5 = vld [vmem:[%s204_s0] sm:$0xff]  ;;  %v133_v29 = vld [vmem:[%s204_s0 + $0x10] sm:$0xf] }
   0x4   :  { %v50_v4 = vsel %vm48_vm0, %v16_v3, 0  ;;  %v28_v19 = vld [vmem:[%s203_s1 + $0x20] sm:$0x3] }
   0x5   :  { %59 = vmatpush.bf16.msra.mxu0 %v50_v4  ;;  %107 = vperm.xlu2 %150, %v28_v19  }
   0x8   :  { %138 = vmatmul.msk.bf16.vlgmr.msra.gmra.mxu0 %vm44_vm1, %v145_v5 }
   0xa   :  { %76 = vperm.xlu1 %149, %v27_v8  }
   0xb   :  { %36 = vperm.xlu0 %148, %v25_v6  }
  0x5f   :  { %v108_v30 = vpop.permute.xlu2 %107 }
  0x74   :  { %v72_v20 = vpop.permute.xlu1 %71 }
  0x75   :  { %v32_v9 = vpop.permute.xlu0 %31 }
  0x7c   :  { %v77_v23 = vpop.permute.xlu1 %76 }
  0x7d   :  { %v37_v12 = vpop.permute.xlu0 %36 }
  0x85   :  { %v61_v10 = vpop.f32.mrf.mxu0 }
  0x86   :  { %v62_v11 = vadd.f32 %v61_v10, %v32_v9 }
  0x88   :  { %v66_v15 = vmax.f32 %v62_v11, 0.0 }
  0x8d   :  { %v63_v13 = vpop.f32.mrf.mxu0 }
  0x8e   :  { %v64_v14 = vadd.f32 %v63_v13, %v37_v12 }
  0x90   :  { %v67_v16 = vmax.f32 %v64_v14, 0.0 }
  0x92   :  { %v68_v17 = vpack.c.bf16 %v67_v16, %v66_v15 }
  0x94   :  { %95 = vmatpush.bf16.msra.mxu1 %v68_v17 }
  0x97   :  { %143 = vmatmul.msk.bf16.vlgmr.msra.gmra.mxu1 %vm84_vm2, %v146_v18 }
 0x114   :  { %v97_v21 = vpop.f32.mrf.mxu1 }
 0x115   :  { %v98_v22 = vadd.f32 %v97_v21, %v72_v20 }
 0x117   :  { %v102_v26 = vmax.f32 %v98_v22, 0.0 }
 0x11c   :  { %v99_v24 = vpop.f32.mrf.mxu1 }
 0x11d   :  { %v100_v25 = vadd.f32 %v99_v24, %v77_v23 }
 0x11f   :  { %v103_v27 = vmax.f32 %v100_v25, 0.0 }
 0x121   :  { %v104_v28 = vpack.c.bf16 %v103_v27, %v102_v26 }
 0x123   :  { %120 = vmatpush.bf16.msra.mxu2 %v104_v28 }
 0x126   :  { %144 = vmatmul.msk.bf16.vlgmr.msra.gmra.mxu2 %vm84_vm2, %v133_v29 }
 0x1a9   :  { %v122_v31 = vpop.f32.mrf.mxu2 }
 0x1aa   :  { %v123_v32 = vadd.f32 %v122_v31, %v108_v30 }
 0x1ac   :  { %126 = vst [vmem:[%s205_s3] sm:$0x3] %v123_v32 }
 0x1b1   :  { %v124_v33 = vpop.f32.mrf.mxu2 }

</bundles_post_ra>
